<compile_context>
chip_gen: v7x
topology: tpu7x:2x2x1
jax: 0.10.0
libtpu: 0.0.40
codegen_flags: <defaults>
</compile_context>

<pallas_src>
import functools

import jax
import jax.numpy as jnp
from jax.experimental import pallas as pl
from jax.experimental.pallas import tpu as pltpu

SCALE = 2.0343017578125e-05
P_DROP = 0.3


def _pick_group(bh, cap=16):
    """Largest divisor of bh that is <= cap (heads processed per grid step)."""
    g = 1
    for d in range(1, min(bh, cap) + 1):
        if bh % d == 0:
            g = d
    return g


# ---------------------------------------------------------------------------
# Init-time kernel: softmax((A @ A^T) * scale) for a group of G heads.
# ---------------------------------------------------------------------------
def _softmax_scores_kernel(a_ref, p_ref, *, scale):
    a = a_ref[...]  # (G, S, D), f32
    # Batched Q@K^T with Q = K = A  ->  (G, S, S).  (einsum, NOT .T: .T on a
    # 3-D array would reverse all axes and compute the wrong contraction.)
    s = jnp.einsum("gqd,gkd->gqk", a, a,
                   preferred_element_type=jnp.float32) * scale
    m = jnp.max(s, axis=-1, keepdims=True)
    e = jnp.exp(s - m)
    p_ref[...] = (e * (1.0 / jnp.sum(e, axis=-1, keepdims=True))).astype(
        p_ref.dtype)


def softmax_scores_pallas(a):
    """a: (BH, S, D) -> softmax probabilities (BH, S, S)."""
    BH, S, D = a.shape
    G = _pick_group(BH)
    kernel = functools.partial(_softmax_scores_kernel, scale=SCALE)
    return pl.pallas_call(
        kernel,
        out_shape=jax.ShapeDtypeStruct((BH, S, S), jnp.float32),
        grid=(BH // G,),
        in_specs=[pl.BlockSpec((G, S, D), lambda i: (i, 0, 0))],
        out_specs=pl.BlockSpec((G, S, S), lambda i: (i, 0, 0)),
        compiler_params=pltpu.CompilerParams(
            dimension_semantics=("parallel",)),
    )(a)


# ---------------------------------------------------------------------------
# Forward kernel: out = attn @ x1 for a group of G heads.
# ---------------------------------------------------------------------------
def _attn_apply_kernel(p_ref, x_ref, o_ref):
    o_ref[...] = jnp.einsum(
        "gqk,gkd->gqd", p_ref[...], x_ref[...],
        preferred_element_type=jnp.float32).astype(o_ref.dtype)


def attn_apply_pallas(attn, x):
    """attn: (BH, S, S), x: (BH, S, D) -> (BH, S, D)."""
    BH, S, _ = attn.shape
    D = x.shape[-1]
    G = _pick_group(BH)
    return pl.pallas_call(
        _attn_apply_kernel,
        out_shape=jax.ShapeDtypeStruct((BH, S, D), jnp.float32),
        grid=(BH // G,),
        in_specs=[
            pl.BlockSpec((G, S, S), lambda i: (i, 0, 0)),
            pl.BlockSpec((G, S, D), lambda i: (i, 0, 0)),
        ],
        out_specs=pl.BlockSpec((G, S, D), lambda i: (i, 0, 0)),
        compiler_params=pltpu.CompilerParams(
            dimension_semantics=("parallel",)),
    )(attn, x)


# ---------------------------------------------------------------------------
# Module-level wrappers mirroring the torch Model.
# ---------------------------------------------------------------------------
def build_attention(a_bhsd, key, *, training, p_drop=P_DROP):
    """__init__-time work: dropout(softmax((A A^T) * scale)), like the module."""
    B, H, S, D = a_bhsd.shape
    attn = softmax_scores_pallas(a_bhsd.reshape(B * H, S, D))
    if training:
        # TODO(synk): torch's dropout RNG bitstream cannot be reproduced
        # exactly; only the distribution (p=0.3) and 1/(1-p) scaling match.
        keep = jax.random.bernoulli(key, 1.0 - p_drop, attn.shape)
        attn = jnp.where(keep, attn * (1.0 / (1.0 - p_drop)), 0.0)
    return attn.reshape(B, H, S, S)


def model_forward(attn_bhss, x1_bhsd):
    """forward(x1) = self.dropout_qk.matmul(x1)."""
    B, H, S, _ = attn_bhss.shape
    D = x1_bhsd.shape[-1]
    out = attn_apply_pallas(attn_bhss.reshape(B * H, S, S),
                            x1_bhsd.reshape(B * H, S, D))
    return out.reshape(B, H, S, D)


if __name__ == "__main__":
    # Small shapes consistent with the module's (1, 2, 4, 4) pattern, scaled up
    # a bit: batch=2, heads=8, seq=8, head_dim=16.
    B, H, S, D = 2, 8, 8, 16
    key = jax.random.PRNGKey(0)
    k_a, k_x, k_drop = jax.random.split(key, 3)

    # Deterministic "parameter" standing in for the fixed tensor `mul_3`
    # computed in the (broken) __init__, plus the forward input x1.
    a = jax.random.normal(k_a, (B, H, S, D), dtype=jnp.float32)
    x1 = jax.random.normal(k_x, (B, H, S, D), dtype=jnp.float32)

    # ---- Eval mode (no dropout) -------------------------------------------
    attn_eval = build_attention(a, k_drop, training=False)
    out_eval = model_forward(attn_eval, x1)
    jax.block_until_ready(out_eval)

    s_ref = jnp.einsum("bhqd,bhkd->bhqk", a, a) * SCALE
    p_ref = jax.nn.softmax(s_ref, axis=-1)
    ref_out = jnp.einsum("bhqk,bhkd->bhqd", p_ref, x1)
    assert attn_eval.shape == (B, H, S, S)
    assert jnp.allclose(attn_eval, p_ref, atol=1e-5, rtol=1e-5), "softmax mismatch"
    assert out_eval.shape == (B, H, S, D)
    assert jnp.allclose(out_eval, ref_out, atol=1e-5, rtol=1e-5), "eval mismatch"

    # ---- Training mode (p=0.3 inverted dropout applied once at init) -------
    attn_train = build_attention(a, k_drop, training=True)
    out_train = model_forward(attn_train, x1)
    jax.block_until_ready(out_train)
    ref_train = jnp.einsum("bhqk,bhkd->bhqd", attn_train, x1)
    assert out_train.shape == (B, H, S, D)
    assert jnp.allclose(out_train, ref_train, atol=1e-5, rtol=1e-5), "train mismatch"
    assert bool(jnp.all(jnp.isfinite(out_train)))

    print("KERNEL_OK")
</pallas_src>

<mosaic_0001>
module attributes {stable_mosaic.version = 11 : i64} {
  func.func @_softmax_scores_kernel(%arg0: i32, %arg1: memref<16x8x16xf32, #tpu.memory_space<vmem>>, %arg2: memref<16x8x8xf32, #tpu.memory_space<vmem>>) attributes {dimension_semantics = [#tpu.dimension_semantics<parallel>], iteration_bounds = array<i64: 1>, scalar_prefetch = 0 : i64, scratch_operands = 0 : i64, tpu.core_type = #tpu.core_type<tc>, window_params = [{transform_indices = @transform_0, window_bounds = array<i64: 16, 8, 16>}, {transform_indices = @transform_1, window_bounds = array<i64: 16, 8, 8>}]} {
    %c0 = arith.constant 0 : index
    %c0_0 = arith.constant 0 : index
    %c0_1 = arith.constant 0 : index
    %0 = vector.load %arg1[%c0, %c0_0, %c0_1] : memref<16x8x16xf32, #tpu.memory_space<vmem>>, vector<16x8x16xf32>
    "tpu.trace_start"() <{level = 10 : i32, message = "gqd,gkd->gqk"}> : () -> ()
    %cst = arith.constant dense<0.000000e+00> : vector<16x8x8xf32>
    %1 = tpu.matmul %0, %0, %cst {dimension_numbers = #tpu.dot_dimension_numbers<[2], [2], [1], [1], [0, 0, 0, 1, 1, 1], [0], [0]>} : vector<16x8x16xf32>, vector<16x8x16xf32>, vector<16x8x8xf32> -> vector<16x8x8xf32>
    "tpu.trace_stop"() : () -> ()
    %cst_2 = arith.constant 2.03430172E-5 : f32
    %2 = vector.broadcast %cst_2 : f32 to vector<16x8x8xf32>
    %3 = arith.mulf %1, %2 : vector<16x8x8xf32>
    %cst_3 = arith.constant dense<0xFF800000> : vector<16x8xf32>
    %4 = vector.multi_reduction <maximumf>, %3, %cst_3 [2] : vector<16x8x8xf32> to vector<16x8xf32>
    %5 = vector.shape_cast %4 : vector<16x8xf32> to vector<16x8x1xf32>
    %6 = vector.broadcast %5 : vector<16x8x1xf32> to vector<16x8x8xf32>
    %7 = arith.subf %3, %6 : vector<16x8x8xf32>
    %8 = math.exp %7 : vector<16x8x8xf32>
    %cst_4 = arith.constant dense<0.000000e+00> : vector<16x8xf32>
    %9 = vector.multi_reduction <add>, %8, %cst_4 [2] : vector<16x8x8xf32> to vector<16x8xf32>
    %10 = vector.shape_cast %9 : vector<16x8xf32> to vector<16x8x1xf32>
    %cst_5 = arith.constant 1.000000e+00 : f32
    %11 = vector.broadcast %cst_5 : f32 to vector<16x8x1xf32>
    %12 = arith.divf %11, %10 : vector<16x8x1xf32>
    %13 = vector.broadcast %12 : vector<16x8x1xf32> to vector<16x8x8xf32>
    %14 = arith.mulf %8, %13 : vector<16x8x8xf32>
    %c0_6 = arith.constant 0 : index
    %c0_7 = arith.constant 0 : index
    %c0_8 = arith.constant 0 : index
    %15 = vector.load %arg2[%c0_6, %c0_7, %c0_8] : memref<16x8x8xf32, #tpu.memory_space<vmem>>, vector<16x8x8xf32>
    tpu.vector_store %arg2[%c0_6, %c0_7, %c0_8], %14 {strides = array<i32>} : memref<16x8x8xf32, #tpu.memory_space<vmem>>, vector<16x8x8xf32>,
    return
  }
  func.func @transform_0(%arg0: i32) -> (i32, i32, i32) {
    %c0_i32 = arith.constant 0 : i32
    %c0_i32_0 = arith.constant 0 : i32
    %c0_i32_1 = arith.constant 0 : i32
    return %arg0, %c0_i32, %c0_i32_0 : i32, i32, i32
  }
  func.func @transform_1(%arg0: i32) -> (i32, i32, i32) {
    %c0_i32 = arith.constant 0 : i32
    %c0_i32_0 = arith.constant 0 : i32
    %c0_i32_1 = arith.constant 0 : i32
    return %arg0, %c0_i32, %c0_i32_0 : i32, i32, i32
  }
}

</mosaic_0001>

<bundles_post_ra>
// kernel: tpu_custom_call.1
= control target key start
LH: loop header
LB: loop body
LE: loop exit
PB: predicated region body
PF: predicated region fallthrough
CT: control target
= control target key end

     0   :  { %6 = vsyncpa [#allocation3], 0  ;;  %s1674_s6 = smov [#allocation2]   ;;  %s2005_s0 = inlined_call_operand.hbm [shape: f32[16,8,16], index: 0, kind: input, shape index: {}]   ;;  %s2006_s1 = inlined_call_operand.vmem [shape: f32[16,8,8], index: 1, kind: output, shape index: {}]  }
   0x1   :  { %s12_s7 = sshll.u32 %s1674_s6, 4  ;;  %s1650_s10 = scalar_lea.hbm %s2005_s0, 2048  ;;  %s13_s7 = int_to_ptr.vmem [resolvable:$true] %s12_s7 }
   0x2   :  { %p1651_p0 = scmp.ne.s32.totalorder %s2005_s0, %s1650_s10  ;;  %p1654_p1 = scmp.lt.u32.totalorder %s1650_s10, %s2005_s0 }
   0x4   :  { %p1656_p2 = pnand %p1654_p1, %p1651_p0 }
   0x6   :  { %1659 = shalt.err (!%p1656_p2)
}
   0x7   :  { %s1660_s15 = scalar_lea.vmem %s13_s7, 2048  ;;  %p1665_p4 = scmp.lt.s32.totalorder %s13_s7, %s13_s7 }
   0x8   :  { %p1661_p3 = scmp.ne.s32.totalorder %s13_s7, %s1660_s15  ;;  %p1666_p5 = scmp.lt.s32.totalorder %s1660_s15, %s1660_s15 }
   0xa   :  { %p1667_p6 = por %p1666_p5, %p1665_p4 }
   0xc   :  { %p1668_p7 = pnand %p1667_p6, %p1661_p3 }
   0xe   :  { %1671 = shalt.err (!%p1668_p7)
}
   0xf   :  { %s1675_s16 = smov 128   ;;  %s1676_s17 = smov 8  }
  0x10   :  { %18 = dma.hbm_to_vmem [thread:$0]  %s2005_s0, 2048, %s13_s7, [#allocation3], %s1675_s16, %s1675_s16, %s1676_s17  }
  0x11   :  { %1672 = dma.done.wait [#allocation3], 2048  }
  0x12   :  { %1673 = vsyncadd [#allocation3], 4294965248  ;;  %v1677_v0 = vmov 0.0   ;;  %vm1678_vm0 = vmmov 0   ;;  %vm38_vm1 = vcmask 130048   ;;  %v22_v1 = vld [vmem:[#allocation2] sm:$0xff] }
  0x13   :  { %1501 = vmatprep.subr.mxu0 %v1677_v0  ;;  %1503 = vmatprep.mubr.msk.f32.mxu0 %vm1678_vm0, %v1677_v0  ;;  %v23_v2 = vld [vmem:[#allocation2 + $0x8] sm:$0xff]  ;;  %v24_v3 = vld [vmem:[#allocation2 + $0x10] sm:$0xff]  ;;  %v25_v4 = vld [vmem:[#allocation2 + $0x18] sm:$0xff]  ;;  %vm1223_vm2 = vcmask 64512  }
  0x14   :  { %1506 = vmatprep.subr.mxu1 %v1677_v0  ;;  %1508 = vmatprep.mubr.msk.f32.mxu1 %vm1678_vm0, %v1677_v0  ;;  %v26_v5 = vld [vmem:[#allocation2 + $0x20] sm:$0xff]  ;;  %v27_v6 = vld [vmem:[#allocation2 + $0x28] sm:$0xff]  ;;  %v28_v7 = vld [vmem:[#allocation2 + $0x30] sm:$0xff] }
  0x15   :  { %1502 = vmatpush3.xpose.msk.msra.mxu0 %vm38_vm1, %v22_v1  ;;  %1507 = vmatpush3.xpose.msk.msra.mxu1 %vm38_vm1, %v23_v2  ;;  %v29_v8 = vld [vmem:[#allocation2 + $0x38] sm:$0xff]  ;;  %v30_v9 = vld [vmem:[#allocation2 + $0x40] sm:$0xff]  ;;  %v31_v10 = vld [vmem:[#allocation2 + $0x48] sm:$0xff] }
  0x16   :  { %1511 = vmatprep.subr.mxu0 %v1677_v0  ;;  %1516 = vmatprep.subr.mxu1 %v1677_v0  ;;  %v32_v11 = vld [vmem:[#allocation2 + $0x50] sm:$0xff]  ;;  %v33_v12 = vld [vmem:[#allocation2 + $0x58] sm:$0xff]  ;;  %v34_v13 = vld [vmem:[#allocation2 + $0x60] sm:$0xff] }
  0x17   :  { %v35_v14 = vld [vmem:[#allocation2 + $0x68] sm:$0xff]  ;;  %v36_v15 = vld [vmem:[#allocation2 + $0x70] sm:$0xff]  ;;  %v37_v16 = vld [vmem:[#allocation2 + $0x78] sm:$0xff] }
  0x18   :  { %1504 = vmatmul.mubr.msk.f32.vlgmr.msra.gmra.mrb[0].mxu0 %vm38_vm1, %v22_v1  ;;  %1509 = vmatmul.mubr.msk.f32.vlgmr.msra.gmra.mrb[0].mxu1 %vm38_vm1, %v23_v2 }
  0x19   :  { %1512 = vmatpush3.xpose.msk.msra.mxu0 %vm38_vm1, %v24_v3  ;;  %1513 = vmatprep.mubr.msk.f32.mxu0 %vm1678_vm0, %v1677_v0 }
  0x1a   :  { %1521 = vmatprep.subr.mxu0 %v1677_v0  ;;  %1517 = vmatpush3.xpose.msk.msra.mxu1 %vm38_vm1, %v25_v4 }
  0x1b   :  { %1518 = vmatprep.mubr.msk.f32.mxu1 %vm1678_vm0, %v1677_v0  ;;  %1526 = vmatprep.subr.mxu1 %v1677_v0 }
  0x1c   :  { %1514 = vmatmul.mubr.msk.f32.vlgmr.msra.gmra.mrb[2].mxu0 %vm38_vm1, %v24_v3 }
  0x1d   :  { %1522 = vmatpush3.xpose.msk.msra.mxu0 %vm38_vm1, %v26_v5  ;;  %1523 = vmatprep.mubr.msk.f32.mxu0 %vm1678_vm0, %v1677_v0 }
  0x1e   :  { %1519 = vmatmul.mubr.msk.f32.vlgmr.msra.gmra.mrb[2].mxu1 %vm38_vm1, %v25_v4  ;;  %1531 = vmatprep.subr.mxu0 %v1677_v0 }
  0x1f   :  { %1527 = vmatpush3.xpose.msk.msra.mxu1 %vm38_vm1, %v27_v6  ;;  %1528 = vmatprep.mubr.msk.f32.mxu1 %vm1678_vm0, %v1677_v0 }
  0x20   :  { %1524 = vmatmul.mubr.msk.f32.vlgmr.msra.gmra.mrb[4].mxu0 %vm38_vm1, %v26_v5  ;;  %1536 = vmatprep.subr.mxu1 %v1677_v0 }
  0x21   :  { %1532 = vmatpush3.xpose.msk.msra.mxu0 %vm38_vm1, %v28_v7  ;;  %1533 = vmatprep.mubr.msk.f32.mxu0 %vm1678_vm0, %v1677_v0 }
  0x22   :  { %1529 = vmatmul.mubr.msk.f32.vlgmr.msra.gmra.mrb[4].mxu1 %vm38_vm1, %v27_v6  ;;  %1541 = vmatprep.subr.mxu0 %v1677_v0 }
  0x23   :  { %1537 = vmatpush3.xpose.msk.msra.mxu1 %vm38_vm1, %v29_v8  ;;  %1538 = vmatprep.mubr.msk.f32.mxu1 %vm1678_vm0, %v1677_v0 }
  0x24   :  { %1534 = vmatmul.mubr.msk.f32.vlgmr.msra.gmra.mrb[6].mxu0 %vm38_vm1, %v28_v7  ;;  %1546 = vmatprep.subr.mxu1 %v1677_v0 }
  0x25   :  { %1542 = vmatpush3.xpose.msk.msra.mxu0 %vm38_vm1, %v30_v9  ;;  %1543 = vmatprep.mubr.msk.f32.mxu0 %vm1678_vm0, %v1677_v0 }
  0x26   :  { %1539 = vmatmul.mubr.msk.f32.vlgmr.msra.gmra.mrb[6].mxu1 %vm38_vm1, %v29_v8  ;;  %1551 = vmatprep.subr.mxu0 %v1677_v0 }
  0x27   :  { %1547 = vmatpush3.xpose.msk.msra.mxu1 %vm38_vm1, %v31_v10  ;;  %1548 = vmatprep.mubr.msk.f32.mxu1 %vm1678_vm0, %v1677_v0 }
  0x28   :  { %1544 = vmatmul.mubr.msk.f32.vlgmr.msra.gmra.mrb[8].mxu0 %vm38_vm1, %v30_v9  ;;  %1556 = vmatprep.subr.mxu1 %v1677_v0 }
  0x29   :  { %1552 = vmatpush3.xpose.msk.msra.mxu0 %vm38_vm1, %v32_v11  ;;  %1553 = vmatprep.mubr.msk.f32.mxu0 %vm1678_vm0, %v1677_v0 }
  0x2a   :  { %1549 = vmatmul.mubr.msk.f32.vlgmr.msra.gmra.mrb[8].mxu1 %vm38_vm1, %v31_v10  ;;  %1561 = vmatprep.subr.mxu0 %v1677_v0 }
  0x2b   :  { %1557 = vmatpush3.xpose.msk.msra.mxu1 %vm38_vm1, %v33_v12  ;;  %1558 = vmatprep.mubr.msk.f32.mxu1 %vm1678_vm0, %v1677_v0 }
  0x2c   :  { %1554 = vmatmul.mubr.msk.f32.vlgmr.msra.gmra.mrb[10].mxu0 %vm38_vm1, %v32_v11  ;;  %1566 = vmatprep.subr.mxu1 %v1677_v0 }
  0x2d   :  { %1562 = vmatpush3.xpose.msk.msra.mxu0 %vm38_vm1, %v34_v13  ;;  %1563 = vmatprep.mubr.msk.f32.mxu0 %vm1678_vm0, %v1677_v0 }
  0x2e   :  { %1559 = vmatmul.mubr.msk.f32.vlgmr.msra.gmra.mrb[10].mxu1 %vm38_vm1, %v33_v12  ;;  %1571 = vmatprep.subr.mxu0 %v1677_v0 }
  0x2f   :  { %1567 = vmatpush3.xpose.msk.msra.mxu1 %vm38_vm1, %v35_v14  ;;  %1568 = vmatprep.mubr.msk.f32.mxu1 %vm1678_vm0, %v1677_v0 }
  0x30   :  { %1564 = vmatmul.mubr.msk.f32.vlgmr.msra.gmra.mrb[12].mxu0 %vm38_vm1, %v34_v13  ;;  %1576 = vmatprep.subr.mxu1 %v1677_v0 }
  0x31   :  { %1572 = vmatpush3.xpose.msk.msra.mxu0 %vm38_vm1, %v36_v15  ;;  %1573 = vmatprep.mubr.msk.f32.mxu0 %vm1678_vm0, %v1677_v0 }
  0x32   :  { %1569 = vmatmul.mubr.msk.f32.vlgmr.msra.gmra.mrb[12].mxu1 %vm38_vm1, %v35_v14 }
  0x33   :  { %1577 = vmatpush3.xpose.msk.msra.mxu1 %vm38_vm1, %v37_v16  ;;  %1578 = vmatprep.mubr.msk.f32.mxu1 %vm1678_vm0, %v1677_v0 }
  0x34   :  { %1574 = vmatmul.mubr.msk.f32.vlgmr.msra.gmra.mrb[14].mxu0 %vm38_vm1, %v36_v15 }
  0x36   :  { %1579 = vmatmul.mubr.msk.f32.vlgmr.msra.gmra.mrb[14].mxu1 %vm38_vm1, %v37_v16 }
  0xeb   :  { %v108_v17 = vpop.f32.mrb[0].mxu0  ;;  %v181_v18 = vpop.f32.mrb[0].mxu1 }
  0xec   :  { %v1781_v19 = vmul.f32 2.0343017e-05, %v108_v17  ;;  %v1505_v20 = vpop.f32.mrb[1].mxu0  ;;  %v1783_v21 = vmul.f32 2.0343017e-05, %v181_v18  ;;  %v1510_v22 = vpop.f32.mrb[1].mxu1 }
  0xee   :  { %v1224_v23 = vsel %vm1223_vm2, %v1781_v19, -inf  ;;  %v1227_v27 = vsel %vm1223_vm2, %v1783_v21, -inf }
  0xef   :  { %1225 = vmax.xlane.f32.xlu0 %v1224_v23  ;;  %v254_v24 = vpop.f32.mrb[2].mxu0 }
  0xf0   :  { %v1787_v25 = vmul.f32 2.0343017e-05, %v254_v24  ;;  %v1515_v26 = vpop.f32.mrb[3].mxu0 }
  0xf1   :  { %v327_v28 = vpop.f32.mrb[2].mxu1 }
  0xf2   :  { %v1791_v29 = vmul.f32 2.0343017e-05, %v327_v28  ;;  %v1230_v30 = vsel %vm1223_vm2, %v1787_v25, -inf  ;;  %v1520_v31 = vpop.f32.mrb[3].mxu1 }
  0xf3   :  { %1228 = vmax.xlane.f32.xlu0 %v1227_v27  ;;  %1231 = vmax.xlane.f32.xlu1 %v1230_v30  ;;  %v400_v32 = vpop.f32.mrb[4].mxu0 }
  0xf4   :  { %v1795_v33 = vmul.f32 2.0343017e-05, %v400_v32  ;;  %v1525_v34 = vpop.f32.mrb[5].mxu0  ;;  %v1233_v35 = vsel %vm1223_vm2, %v1791_v29, -inf }
  0xf5   :  { %v473_v36 = vpop.f32.mrb[4].mxu1 }
  0xf6   :  { %v1799_v37 = vmul.f32 2.0343017e-05, %v473_v36  ;;  %v1236_v38 = vsel %vm1223_vm2, %v1795_v33, -inf  ;;  %v1530_v39 = vpop.f32.mrb[5].mxu1 }
  0xf7   :  { %1234 = vmax.xlane.f32.xlu1 %v1233_v35  ;;  %1237 = vmax.xlane.f32.xlu0 %v1236_v38  ;;  %v546_v40 = vpop.f32.mrb[6].mxu0 }
  0xf8   :  { %v1803_v41 = vmul.f32 2.0343017e-05, %v546_v40  ;;  %v1535_v42 = vpop.f32.mrb[7].mxu0  ;;  %v1239_v43 = vsel %vm1223_vm2, %v1799_v37, -inf }
  0xf9   :  { %v619_v44 = vpop.f32.mrb[6].mxu1 }
  0xfa   :  { %v1807_v45 = vmul.f32 2.0343017e-05, %v619_v44  ;;  %v1242_v46 = vsel %vm1223_vm2, %v1803_v41, -inf  ;;  %v1540_v47 = vpop.f32.mrb[7].mxu1 }
  0xfb   :  { %1240 = vmax.xlane.f32.xlu1 %v1239_v43  ;;  %1243 = vmax.xlane.f32.xlu0 %v1242_v46  ;;  %v692_v48 = vpop.f32.mrb[8].mxu0 }
  0xfc   :  { %v1811_v49 = vmul.f32 2.0343017e-05, %v692_v48  ;;  %v1545_v50 = vpop.f32.mrb[9].mxu0  ;;  %v1245_v51 = vsel %vm1223_vm2, %v1807_v45, -inf }
  0xfd   :  { %v765_v52 = vpop.f32.mrb[8].mxu1 }
  0xfe   :  { %v1815_v53 = vmul.f32 2.0343017e-05, %v765_v52  ;;  %v1248_v54 = vsel %vm1223_vm2, %v1811_v49, -inf  ;;  %v1550_v55 = vpop.f32.mrb[9].mxu1 }
  0xff   :  { %1246 = vmax.xlane.f32.xlu1 %v1245_v51  ;;  %1249 = vmax.xlane.f32.xlu0 %v1248_v54  ;;  %v838_v56 = vpop.f32.mrb[10].mxu0 }
 0x100   :  { %v1819_v57 = vmul.f32 2.0343017e-05, %v838_v56  ;;  %v1555_v58 = vpop.f32.mrb[11].mxu0  ;;  %v1251_v59 = vsel %vm1223_vm2, %v1815_v53, -inf }
 0x101   :  { %v911_v60 = vpop.f32.mrb[10].mxu1 }
 0x102   :  { %v1823_v61 = vmul.f32 2.0343017e-05, %v911_v60  ;;  %v1254_v62 = vsel %vm1223_vm2, %v1819_v57, -inf  ;;  %v1560_v63 = vpop.f32.mrb[11].mxu1 }
 0x103   :  { %1252 = vmax.xlane.f32.xlu1 %v1251_v59  ;;  %1255 = vmax.xlane.f32.xlu0 %v1254_v62  ;;  %v984_v0 = vpop.f32.mrb[12].mxu0 }
 0x104   :  { %v1827_v1 = vmul.f32 2.0343017e-05, %v984_v0  ;;  %v1565_v2 = vpop.f32.mrb[13].mxu0  ;;  %v1257_v3 = vsel %vm1223_vm2, %v1823_v61, -inf }
 0x105   :  { %v1057_v4 = vpop.f32.mrb[12].mxu1 }
 0x106   :  { %v1831_v5 = vmul.f32 2.0343017e-05, %v1057_v4  ;;  %v1260_v6 = vsel %vm1223_vm2, %v1827_v1, -inf  ;;  %v1570_v7 = vpop.f32.mrb[13].mxu1 }
 0x107   :  { %1258 = vmax.xlane.f32.xlu1 %v1257_v3  ;;  %1261 = vmax.xlane.f32.xlu0 %v1260_v6  ;;  %v1130_v8 = vpop.f32.mrb[14].mxu0 }
 0x108   :  { %v1835_v9 = vmul.f32 2.0343017e-05, %v1130_v8  ;;  %v1263_v10 = vsel %vm1223_vm2, %v1831_v5, -inf  ;;  %v1575_v11 = vpop.f32.mrb[15].mxu0 }
 0x109   :  { %v1203_v12 = vpop.f32.mrb[14].mxu1 }
 0x10a   :  { %v1839_v13 = vmul.f32 2.0343017e-05, %v1203_v12  ;;  %v1266_v14 = vsel %vm1223_vm2, %v1835_v9, -inf  ;;  %v1580_v15 = vpop.f32.mrb[15].mxu1 }
 0x10b   :  { %1264 = vmax.xlane.f32.xlu1 %v1263_v10  ;;  %1267 = vmax.xlane.f32.xlu0 %v1266_v14 }
 0x10c   :  { %v1269_v16 = vsel %vm1223_vm2, %v1839_v13, -inf }
 0x10f   :  { %1270 = vmax.xlane.f32.xlu1 %v1269_v16 }
 0x17c   :  { %v1226_v17 = vpop.xlane.xlu0 %1225 }
 0x17d   :  { %v1272_v18 = vsub.f32 %v1781_v19, %v1226_v17 }
 0x17f   :  { %v1288_v20 = vmul.f32 1.442695, %v1272_v18 }
 0x180   :  { %v1229_v22 = vpop.xlane.xlu0 %1228  ;;  %v1232_v23 = vpop.xlane.xlu1 %1231 }
 0x181   :  { %1586 = vpow2.f32 %v1288_v20  ;;  %v1273_v24 = vsub.f32 %v1783_v21, %v1229_v22  ;;  %v1274_v26 = vsub.f32 %v1787_v25, %v1232_v23 }
 0x183   :  { %v1290_v27 = vmul.f32 1.442695, %v1273_v24  ;;  %v1292_v28 = vmul.f32 1.442695, %v1274_v26 }
 0x184   :  { %v1235_v30 = vpop.xlane.xlu1 %1234  ;;  %v1238_v31 = vpop.xlane.xlu0 %1237 }
 0x185   :  { %1588 = vpow2.f32 %v1290_v27  ;;  %v1275_v32 = vsub.f32 %v1791_v29, %v1235_v30  ;;  %v1276_v34 = vsub.f32 %v1795_v33, %v1238_v31 }
 0x186   :  { %1590 = vpow2.f32 %v1292_v28 }
 0x187   :  { %v1294_v35 = vmul.f32 1.442695, %v1275_v32  ;;  %v1296_v19 = vmul.f32 1.442695, %v1276_v34 }
 0x188   :  { %v1241_v36 = vpop.xlane.xlu1 %1240  ;;  %v1244_v38 = vpop.xlane.xlu0 %1243 }
 0x189   :  { %1592 = vpow2.f32 %v1294_v35  ;;  %v1277_v39 = vsub.f32 %v1799_v37, %v1241_v36  ;;  %v1278_v21 = vsub.f32 %v1803_v41, %v1244_v38 }
 0x18a   :  { %1594 = vpow2.f32 %v1296_v19 }
 0x18b   :  { %v1852_v25 = vpop.eup %1586  ;;  %v1298_v40 = vmul.f32 1.442695, %v1277_v39  ;;  %v1300_v42 = vmul.f32 1.442695, %v1278_v21 }
 0x18c   :  { %v1247_v43 = vpop.xlane.xlu1 %1246  ;;  %v1250_v44 = vpop.xlane.xlu0 %1249  ;;  %v1320_v29 = vsel %vm1223_vm2, %v1852_v25, 0.0 }
 0x18d   :  { %1596 = vpow2.f32 %v1298_v40  ;;  %v1279_v33 = vsub.f32 %v1807_v45, %v1247_v43  ;;  %v1280_v46 = vsub.f32 %v1811_v49, %v1250_v44  ;;  %1321 = vadd.xlane.f32.xlu0 %v1320_v29 }
 0x18e   :  { %1598 = vpow2.f32 %v1300_v42 }
 0x18f   :  { %v1858_v37 = vpop.eup %1588  ;;  %v1302_v41 = vmul.f32 1.442695, %v1279_v33  ;;  %v1304_v47 = vmul.f32 1.442695, %v1280_v46 }
 0x190   :  { %v1860_v48 = vpop.eup %1590  ;;  %v1253_v50 = vpop.xlane.xlu1 %1252  ;;  %v1323_v52 = vsel %vm1223_vm2, %v1858_v37, 0.0 }
 0x191   :  { %v1256_v51 = vpop.xlane.xlu0 %1255  ;;  %1600 = vpow2.f32 %v1302_v41  ;;  %v1281_v54 = vsub.f32 %v1815_v53, %v1253_v50  ;;  %1324 = vadd.xlane.f32.xlu1 %v1323_v52  ;;  %v1326_v49 = vsel %vm1223_vm2, %v1860_v48, 0.0 }
 0x192   :  { %v1282_v45 = vsub.f32 %v1819_v57, %v1256_v51  ;;  %1602 = vpow2.f32 %v1304_v47  ;;  %1327 = vadd.xlane.f32.xlu0 %v1326_v49 }
 0x193   :  { %v1868_v55 = vpop.eup %1592  ;;  %v1306_v56 = vmul.f32 1.442695, %v1281_v54 }
 0x194   :  { %v1308_v58 = vmul.f32 1.442695, %v1282_v45  ;;  %v1870_v59 = vpop.eup %1594  ;;  %v1259_v60 = vpop.xlane.xlu1 %1258  ;;  %v1329_v63 = vsel %vm1223_vm2, %v1868_v55, 0.0 }
 0x195   :  { %v1262_v62 = vpop.xlane.xlu0 %1261  ;;  %1604 = vpow2.f32 %v1306_v56  ;;  %v1283_v53 = vsub.f32 %v1823_v61, %v1259_v60  ;;  %1330 = vadd.xlane.f32.xlu1 %v1329_v63  ;;  %v1332_v0 = vsel %vm1223_vm2, %v1870_v59, 0.0 }
 0x196   :  { %v1284_v57 = vsub.f32 %v1827_v1, %v1262_v62  ;;  %1606 = vpow2.f32 %v1308_v58  ;;  %1333 = vadd.xlane.f32.xlu0 %v1332_v0 }
 0x197   :  { %v1878_v2 = vpop.eup %1596  ;;  %v1310_v3 = vmul.f32 1.442695, %v1283_v53 }
 0x198   :  { %v1312_v4 = vmul.f32 1.442695, %v1284_v57  ;;  %v1880_v6 = vpop.eup %1598  ;;  %v1265_v7 = vpop.xlane.xlu1 %1264  ;;  %v1335_v10 = vsel %vm1223_vm2, %v1878_v2, 0.0 }
 0x199   :  { %v1268_v8 = vpop.xlane.xlu0 %1267  ;;  %1608 = vpow2.f32 %v1310_v3  ;;  %v1285_v61 = vsub.f32 %v1831_v5, %v1265_v7  ;;  %1336 = vadd.xlane.f32.xlu1 %v1335_v10  ;;  %v1338_v11 = vsel %vm1223_vm2, %v1880_v6, 0.0 }
 0x19a   :  { %v1286_v1 = vsub.f32 %v1835_v9, %v1268_v8  ;;  %1610 = vpow2.f32 %v1312_v4  ;;  %1339 = vadd.xlane.f32.xlu0 %v1338_v11 }
 0x19b   :  { %v1888_v12 = vpop.eup %1600  ;;  %v1314_v14 = vmul.f32 1.442695, %v1285_v61 }
 0x19c   :  { %v1316_v15 = vmul.f32 1.442695, %v1286_v1  ;;  %v1890_v16 = vpop.eup %1602  ;;  %v1271_v17 = vpop.xlane.xlu1 %1270  ;;  %v1341_v18 = vsel %vm1223_vm2, %v1888_v12, 0.0 }
 0x19d   :  { %1612 = vpow2.f32 %v1314_v14  ;;  %v1287_v5 = vsub.f32 %v1839_v13, %v1271_v17  ;;  %1342 = vadd.xlane.f32.xlu1 %v1341_v18  ;;  %v1344_v9 = vsel %vm1223_vm2, %v1890_v16, 0.0 }
 0x19e   :  { %1614 = vpow2.f32 %v1316_v15  ;;  %1345 = vadd.xlane.f32.xlu0 %v1344_v9 }
 0x19f   :  { %v1897_v20 = vpop.eup %1604  ;;  %v1318_v22 = vmul.f32 1.442695, %v1287_v5 }
 0x1a0   :  { %v1899_v23 = vpop.eup %1606  ;;  %v1347_v24 = vsel %vm1223_vm2, %v1897_v20, 0.0 }
 0x1a1   :  { %1616 = vpow2.f32 %v1318_v22  ;;  %1348 = vadd.xlane.f32.xlu1 %v1347_v24  ;;  %v1350_v26 = vsel %vm1223_vm2, %v1899_v23, 0.0 }
 0x1a2   :  { %1351 = vadd.xlane.f32.xlu0 %v1350_v26 }
 0x1a3   :  { %v1905_v13 = vpop.eup %1608 }
 0x1a4   :  { %v1907_v27 = vpop.eup %1610  ;;  %v1353_v28 = vsel %vm1223_vm2, %v1905_v13, 0.0 }
 0x1a5   :  { %1354 = vadd.xlane.f32.xlu1 %v1353_v28  ;;  %v1356_v30 = vsel %vm1223_vm2, %v1907_v27, 0.0 }
 0x1a6   :  { %1357 = vadd.xlane.f32.xlu0 %v1356_v30 }
 0x1a7   :  { %v1913_v31 = vpop.eup %1612 }
 0x1a8   :  { %v1915_v32 = vpop.eup %1614  ;;  %v1359_v34 = vsel %vm1223_vm2, %v1913_v31, 0.0 }
 0x1a9   :  { %1360 = vadd.xlane.f32.xlu1 %v1359_v34  ;;  %v1362_v35 = vsel %vm1223_vm2, %v1915_v32, 0.0 }
 0x1aa   :  { %1363 = vadd.xlane.f32.xlu0 %v1362_v35 }
 0x1ab   :  { %v1921_v19 = vpop.eup %1616 }
 0x1ac   :  { %v1365_v36 = vsel %vm1223_vm2, %v1921_v19, 0.0 }
 0x1ad   :  { %1366 = vadd.xlane.f32.xlu1 %v1365_v36 }
 0x21a   :  { %v1322_v38 = vpop.xlane.xlu0 %1321 }
 0x21b   :  { %1618 = vrcp.f32 %v1322_v38 }
 0x21e   :  { %v1325_v39 = vpop.xlane.xlu1 %1324 }
 0x21f   :  { %1620 = vrcp.f32 %v1325_v39  ;;  %v1328_v21 = vpop.xlane.xlu0 %1327 }
 0x220   :  { %1622 = vrcp.f32 %v1328_v21 }
 0x222   :  { %v1331_v40 = vpop.xlane.xlu1 %1330 }
 0x223   :  { %1624 = vrcp.f32 %v1331_v40  ;;  %v1334_v42 = vpop.xlane.xlu0 %1333 }
 0x224   :  { %1626 = vrcp.f32 %v1334_v42 }
 0x225   :  { %v1619_v43 = vpop.eup %1618 }
 0x226   :  { %v1400_v44 = vmul.f32 %v1619_v43, %v1852_v25  ;;  %v1337_v29 = vpop.xlane.xlu1 %1336 }
 0x227   :  { %1628 = vrcp.f32 %v1337_v29  ;;  %v1340_v33 = vpop.xlane.xlu0 %1339 }
 0x228   :  { %1416 = vst.msk [vmem:[%s2006_s1] sm:$0xff] %vm1223_vm2, %v1400_v44  ;;  %1630 = vrcp.f32 %v1340_v33 }
 0x229   :  { %v1621_v46 = vpop.eup %1620 }
 0x22a   :  { %v1623_v41 = vpop.eup %1622  ;;  %v1401_v47 = vmul.f32 %v1621_v46, %v1858_v37  ;;  %v1343_v50 = vpop.xlane.xlu1 %1342 }
 0x22b   :  { %v1402_v51 = vmul.f32 %v1623_v41, %v1860_v48  ;;  %1632 = vrcp.f32 %v1343_v50  ;;  %v1346_v52 = vpop.xlane.xlu0 %1345 }
 0x22c   :  { %1417 = vst.msk [vmem:[%s2006_s1 + $0x8] sm:$0xff] %vm1223_vm2, %v1401_v47  ;;  %1634 = vrcp.f32 %v1346_v52 }
 0x22d   :  { %v1625_v25 = vpop.eup %1624  ;;  %1418 = vst.msk [vmem:[%s2006_s1 + $0x10] sm:$0xff] %vm1223_vm2, %v1402_v51 }
 0x22e   :  { %v1627_v54 = vpop.eup %1626  ;;  %v1403_v37 = vmul.f32 %v1625_v25, %v1868_v55  ;;  %v1349_v45 = vpop.xlane.xlu1 %1348 }
 0x22f   :  { %v1404_v48 = vmul.f32 %v1627_v54, %v1870_v59  ;;  %1636 = vrcp.f32 %v1349_v45  ;;  %v1352_v49 = vpop.xlane.xlu0 %1351 }
 0x230   :  { %1419 = vst.msk [vmem:[%s2006_s1 + $0x18] sm:$0xff] %vm1223_vm2, %v1403_v37  ;;  %1638 = vrcp.f32 %v1352_v49 }
 0x231   :  { %v1629_v56 = vpop.eup %1628  ;;  %1420 = vst.msk [vmem:[%s2006_s1 + $0x20] sm:$0xff] %vm1223_vm2, %v1404_v48 }
 0x232   :  { %v1631_v58 = vpop.eup %1630  ;;  %v1405_v55 = vmul.f32 %v1629_v56, %v1878_v2  ;;  %v1355_v60 = vpop.xlane.xlu1 %1354 }
 0x233   :  { %v1406_v59 = vmul.f32 %v1631_v58, %v1880_v6  ;;  %1640 = vrcp.f32 %v1355_v60  ;;  %v1358_v62 = vpop.xlane.xlu0 %1357 }
 0x234   :  { %1421 = vst.msk [vmem:[%s2006_s1 + $0x28] sm:$0xff] %vm1223_vm2, %v1405_v55  ;;  %1642 = vrcp.f32 %v1358_v62 }
 0x235   :  { %v1633_v63 = vpop.eup %1632  ;;  %1422 = vst.msk [vmem:[%s2006_s1 + $0x30] sm:$0xff] %vm1223_vm2, %v1406_v59 }
 0x236   :  { %v1635_v53 = vpop.eup %1634  ;;  %v1407_v57 = vmul.f32 %v1633_v63, %v1888_v12  ;;  %v1361_v0 = vpop.xlane.xlu1 %1360 }
 0x237   :  { %v1408_v2 = vmul.f32 %v1635_v53, %v1890_v16  ;;  %1644 = vrcp.f32 %v1361_v0  ;;  %v1364_v3 = vpop.xlane.xlu0 %1363 }
 0x238   :  { %1423 = vst.msk [vmem:[%s2006_s1 + $0x38] sm:$0xff] %vm1223_vm2, %v1407_v57  ;;  %1646 = vrcp.f32 %v1364_v3 }
 0x239   :  { %v1637_v4 = vpop.eup %1636  ;;  %1424 = vst.msk [vmem:[%s2006_s1 + $0x40] sm:$0xff] %vm1223_vm2, %v1408_v2 }
 0x23a   :  { %v1639_v6 = vpop.eup %1638  ;;  %v1409_v7 = vmul.f32 %v1637_v4, %v1897_v20  ;;  %v1367_v8 = vpop.xlane.xlu1 %1366 }
 0x23b   :  { %v1410_v10 = vmul.f32 %v1639_v6, %v1899_v23  ;;  %1648 = vrcp.f32 %v1367_v8 }
 0x23c   :  { %1425 = vst.msk [vmem:[%s2006_s1 + $0x48] sm:$0xff] %vm1223_vm2, %v1409_v7 }
 0x23d   :  { %v1641_v61 = vpop.eup %1640  ;;  %1426 = vst.msk [vmem:[%s2006_s1 + $0x50] sm:$0xff] %vm1223_vm2, %v1410_v10 }
 0x23e   :  { %v1643_v1 = vpop.eup %1642  ;;  %v1411_v11 = vmul.f32 %v1641_v61, %v1905_v13 }
 0x23f   :  { %v1412_v12 = vmul.f32 %v1643_v1, %v1907_v27 }
 0x240   :  { %1427 = vst.msk [vmem:[%s2006_s1 + $0x58] sm:$0xff] %vm1223_vm2, %v1411_v11 }
 0x241   :  { %v1645_v14 = vpop.eup %1644  ;;  %1428 = vst.msk [vmem:[%s2006_s1 + $0x60] sm:$0xff] %vm1223_vm2, %v1412_v12 }
 0x242   :  { %v1647_v15 = vpop.eup %1646  ;;  %v1413_v16 = vmul.f32 %v1645_v14, %v1913_v31 }
 0x243   :  { %v1414_v17 = vmul.f32 %v1647_v15, %v1915_v32 }
 0x244   :  { %1429 = vst.msk [vmem:[%s2006_s1 + $0x68] sm:$0xff] %vm1223_vm2, %v1413_v16 }
 0x245   :  { %v1649_v18 = vpop.eup %1648  ;;  %1430 = vst.msk [vmem:[%s2006_s1 + $0x70] sm:$0xff] %vm1223_vm2, %v1414_v17 }
 0x246   :  { %v1415_v5 = vmul.f32 %v1649_v18, %v1921_v19 }
 0x248   :  { %1431 = vst.msk [vmem:[%s2006_s1 + $0x78] sm:$0xff] %vm1223_vm2, %v1415_v5 }
 0x249   :  { %1436 = vsyncpa [#allocation3], 1 }

</bundles_post_ra>
